<compile_context>
chip_gen: v5e
topology: v5e:2x2
jax: 0.10.0
libtpu: 0.0.40
codegen_flags: <defaults>
</compile_context>

<pallas_src>
import functools

import jax
import jax.numpy as jnp
from jax.experimental import pallas as pl
from jax.experimental.pallas import tpu as pltpu


def _round_up(x, m):
    return ((x + m - 1) // m) * m


def _proj_kernel(x_ref, w_ref, b_ref, o_ref, *, mxu_bf16):
    # x_ref: (TM, D)      f32 activation tile
    # w_ref: (D, 2*D)     fused [W1^T | W2^T]  (VMEM-resident across grid)
    # b_ref: (1, 2*D)     fused [b1 | b2]      (VMEM-resident across grid)
    # o_ref: (TM, D)
    d = o_ref.shape[-1]
    x = x_ref[...]
    w = w_ref[...]
    if mxu_bf16:  # optional v5e fast path; f32 accumulation kept below
        x = x.astype(jnp.bfloat16)
        w = w.astype(jnp.bfloat16)
    z = jnp.dot(x, w, preferred_element_type=jnp.float32) + b_ref[...]
    # sigmoid(a) == 0.5 * (tanh(a/2) + 1): single EUP push instead of exp+recip.
    gate = 0.5 * (jnp.tanh(0.5 * z[:, :d]) + 1.0)
    update = jnp.tanh(z[:, d:])
    o_ref[...] = (gate * update).astype(o_ref.dtype)


def fuse_params(w1, b1, w2, b2):
    """One-time parameter prep (hoisted out of the per-forward path).

    w1, w2: (D, D) in PyTorch nn.Linear layout (out_features, in_features)
    b1, b2: (D,)
    Returns w_fused (D, 2D) = [W1^T | W2^T] and b_fused (1, 2D) = [b1 | b2].
    """
    w_fused = jnp.concatenate([w1.T, w2.T], axis=1)
    b_fused = jnp.concatenate([b1, b2]).reshape(1, -1)
    return w_fused, b_fused


def new_proj_module_apply(x, w_fused, b_fused, *, tm_max=4096, mxu_bf16=False):
    """sigmoid(x @ w1^T + b1) * tanh(x @ w2^T + b2), same shape as x."""
    orig_shape = x.shape
    D = orig_shape[-1]
    x2d = x.reshape(-1, D)
    N = x2d.shape[0]

    TM = min(tm_max, _round_up(N, 8))   # rows per grid step (multiple of 8)
    grid = (pl.cdiv(N, TM),)            # partial last block handled by Pallas

    cost = pl.CostEstimate(
        flops=2 * N * D * (2 * D),
        transcendentals=2 * N * D,
        bytes_accessed=4 * (N * D + D * 2 * D + 2 * D + N * D),
    )

    out = pl.pallas_call(
        functools.partial(_proj_kernel, mxu_bf16=mxu_bf16),
        out_shape=jax.ShapeDtypeStruct((N, D), x.dtype),
        grid=grid,
        in_specs=[
            pl.BlockSpec((TM, D), lambda i: (i, 0)),        # activation tile
            pl.BlockSpec((D, 2 * D), lambda i: (0, 0)),     # fused weights (resident)
            pl.BlockSpec((1, 2 * D), lambda i: (0, 0)),     # fused bias (resident)
        ],
        out_specs=pl.BlockSpec((TM, D), lambda i: (i, 0)),
        compiler_params=pltpu.CompilerParams(
            dimension_semantics=("parallel",),
            vmem_limit_bytes=32 * 1024 * 1024,
        ),
        cost_estimate=cost,
    )(x2d, w_fused, b_fused)

    return out.reshape(orig_shape)


def new_proj_module(x, w1, b1, w2, b2, **kwargs):
    """Convenience wrapper (fuses params per call; prefer fuse_params + apply)."""
    w_fused, b_fused = fuse_params(w1, b1, w2, b2)
    return new_proj_module_apply(x, w_fused, b_fused, **kwargs)


if __name__ == "__main__":
    # config.dim_word = 50 in the original Config
    DIM_WORD = 50
    BATCH, SEQ = 2, 8

    key = jax.random.PRNGKey(0)
    kx, kw1, kb1, kw2, kb2, kx2 = jax.random.split(key, 6)

    # Deterministic parameter init (PyTorch nn.Linear-style uniform bound)
    bound = 1.0 / (DIM_WORD ** 0.5)
    w1 = jax.random.uniform(kw1, (DIM_WORD, DIM_WORD), jnp.float32, -bound, bound)
    b1 = jax.random.uniform(kb1, (DIM_WORD,), jnp.float32, -bound, bound)
    w2 = jax.random.uniform(kw2, (DIM_WORD, DIM_WORD), jnp.float32, -bound, bound)
    b2 = jax.random.uniform(kb2, (DIM_WORD,), jnp.float32, -bound, bound)

    # Parameter fusion happens ONCE, outside the forward path.
    w_fused, b_fused = fuse_params(w1, b1, w2, b2)
    w_fused, b_fused = jax.block_until_ready((w_fused, b_fused))

    def ref_fn(xx):
        return jax.nn.sigmoid(xx @ w1.T + b1) * jnp.tanh(xx @ w2.T + b2)

    # Primary demo shape (batch=2, seq=8, dim_word=50) -> full row tile.
    x = jax.random.normal(kx, (BATCH, SEQ, DIM_WORD), jnp.float32)
    out = jax.block_until_ready(new_proj_module_apply(x, w_fused, b_fused))
    assert out.shape == x.shape
    assert jnp.allclose(out, ref_fn(x), atol=1e-5, rtol=1e-5)

    # Second shape exercising the partial (remainder) row block path.
    x_odd = jax.random.normal(kx2, (BATCH, SEQ + 1, DIM_WORD), jnp.float32)
    out_odd = jax.block_until_ready(new_proj_module_apply(x_odd, w_fused, b_fused))
    assert out_odd.shape == x_odd.shape
    assert jnp.allclose(out_odd, ref_fn(x_odd), atol=1e-5, rtol=1e-5)

    print("KERNEL_OK")
</pallas_src>

<mosaic_0001>
module attributes {stable_mosaic.version = 11 : i64} {
  func.func @_proj_kernel(%arg0: i32, %arg1: memref<16x50xf32, #tpu.memory_space<vmem>>, %arg2: memref<50x100xf32, #tpu.memory_space<vmem>>, %arg3: memref<1x100xf32, #tpu.memory_space<vmem>>, %arg4: memref<16x50xf32, #tpu.memory_space<vmem>>) attributes {dimension_semantics = [#tpu.dimension_semantics<parallel>], iteration_bounds = array<i64: 1>, scalar_prefetch = 0 : i64, scratch_operands = 0 : i64, tpu.core_type = #tpu.core_type<tc>, window_params = [{transform_indices = @transform_0, window_bounds = array<i64: 16, 50>}, {pipeline_mode = #tpu.pipeline_mode<synchronous>, transform_indices = @transform_1, window_bounds = array<i64: 50, 100>}, {pipeline_mode = #tpu.pipeline_mode<synchronous>, transform_indices = @transform_2, window_bounds = array<i64: 1, 100>}, {transform_indices = @transform_3, window_bounds = array<i64: 16, 50>}]} {
    %c0 = arith.constant 0 : index
    %c0_0 = arith.constant 0 : index
    %0 = vector.load %arg1[%c0, %c0_0] : memref<16x50xf32, #tpu.memory_space<vmem>>, vector<16x50xf32>
    %c0_1 = arith.constant 0 : index
    %c0_2 = arith.constant 0 : index
    %1 = vector.load %arg2[%c0_1, %c0_2] : memref<50x100xf32, #tpu.memory_space<vmem>>, vector<50x100xf32>
    %cst = arith.constant dense<0.000000e+00> : vector<16x100xf32>
    %2 = tpu.matmul %0, %1, %cst {dimension_numbers = #tpu.dot_dimension_numbers<[1], [0], [0], [1], [0, 0, 1, 1], [], []>} : vector<16x50xf32>, vector<50x100xf32>, vector<16x100xf32> -> vector<16x100xf32>
    %c0_3 = arith.constant 0 : index
    %c0_4 = arith.constant 0 : index
    %3 = vector.load %arg3[%c0_3, %c0_4] : memref<1x100xf32, #tpu.memory_space<vmem>>, vector<1x100xf32>
    %4 = vector.broadcast %3 : vector<1x100xf32> to vector<16x100xf32>
    %5 = arith.addf %2, %4 : vector<16x100xf32>
    %6 = vector.extract_strided_slice %5 {offsets = [0, 0], sizes = [16, 50], strides = [1, 1]} : vector<16x100xf32> to vector<16x50xf32>
    %cst_5 = arith.constant 5.000000e-01 : f32
    %7 = vector.broadcast %cst_5 : f32 to vector<16x50xf32>
    %8 = arith.mulf %7, %6 : vector<16x50xf32>
    %9 = math.tanh %8 : vector<16x50xf32>
    %cst_6 = arith.constant 1.000000e+00 : f32
    %10 = vector.broadcast %cst_6 : f32 to vector<16x50xf32>
    %11 = arith.addf %9, %10 : vector<16x50xf32>
    %cst_7 = arith.constant 5.000000e-01 : f32
    %12 = vector.broadcast %cst_7 : f32 to vector<16x50xf32>
    %13 = arith.mulf %12, %11 : vector<16x50xf32>
    %14 = vector.extract_strided_slice %5 {offsets = [0, 50], sizes = [16, 50], strides = [1, 1]} : vector<16x100xf32> to vector<16x50xf32>
    %15 = math.tanh %14 : vector<16x50xf32>
    %16 = arith.mulf %13, %15 : vector<16x50xf32>
    %c0_8 = arith.constant 0 : index
    %c0_9 = arith.constant 0 : index
    %17 = vector.load %arg4[%c0_8, %c0_9] : memref<16x50xf32, #tpu.memory_space<vmem>>, vector<16x50xf32>
    tpu.vector_store %arg4[%c0_8, %c0_9], %16 {strides = array<i32>} : memref<16x50xf32, #tpu.memory_space<vmem>>, vector<16x50xf32>,
    return
  }
  func.func @transform_0(%arg0: i32) -> (i32, i32) {
    %c0_i32 = arith.constant 0 : i32
    %c0_i32_0 = arith.constant 0 : i32
    return %arg0, %c0_i32 : i32, i32
  }
  func.func @transform_1(%arg0: i32) -> (i32, i32) {
    %c0_i32 = arith.constant 0 : i32
    %c0_i32_0 = arith.constant 0 : i32
    %c0_i32_1 = arith.constant 0 : i32
    return %c0_i32, %c0_i32_0 : i32, i32
  }
  func.func @transform_2(%arg0: i32) -> (i32, i32) {
    %c0_i32 = arith.constant 0 : i32
    %c0_i32_0 = arith.constant 0 : i32
    %c0_i32_1 = arith.constant 0 : i32
    return %c0_i32, %c0_i32_0 : i32, i32
  }
  func.func @transform_3(%arg0: i32) -> (i32, i32) {
    %c0_i32 = arith.constant 0 : i32
    %c0_i32_0 = arith.constant 0 : i32
    return %arg0, %c0_i32 : i32, i32
  }
}

</mosaic_0001>

<bundles_post_ra>
// kernel: tpu_custom_call.1
= control target key start
LH: loop header
LB: loop body
LE: loop exit
PB: predicated region body
PF: predicated region fallthrough
CT: control target
= control target key end

     0   :  { %8 = vsyncpa [#allocation3], 0  ;;  %s290_s0 = inlined_call_operand.hbm [shape: f32[16,50], index: 0, kind: input, shape index: {}]   ;;  %s291_s1 = inlined_call_operand.hbm [shape: f32[50,100], index: 1, kind: input, shape index: {}]   ;;  %s292_s2 = inlined_call_operand.vmem [shape: f32[1,100], index: 2, kind: input, shape index: {}]   ;;  %s293_s3 = inlined_call_operand.hbm [shape: f32[16,50], index: 3, kind: output, shape index: {}]  }
   0x1   :  { %9 = vsyncpa [#allocation6], 0 }
   0x2   :  { %10 = vsyncpa [#allocation4], 0  ;;  %s15_s14 = sshll.u32 %s290_s0, 4  ;;  %s239_s15 = smov [#allocation2]   ;;  %s16_s14 = int_to_ptr.hbm [resolvable:$true] %s15_s14 }
   0x3   :  { %s17_s16 = sshll.u32 %s239_s15, 4  ;;  %s28_s19 = sshll.u32 %s291_s1, 4  ;;  %s18_s16 = int_to_ptr.vmem [resolvable:$true] %s17_s16  ;;  %s29_s19 = int_to_ptr.hbm [resolvable:$true] %s28_s19 }
   0x4   :  { %s240_s20 = smov 128   ;;  %s241_s21 = smov 8  }
   0x5   :  { %23 = dma.hbm_to_vmem [thread:$0]  %s16_s14, 256, %s18_s16, [#allocation3], %s240_s20, %s240_s20, %s241_s21  }
   0x6   :  { %s242_s22 = smov [#allocation5]  }
   0x7   :  { %s30_s23 = sshll.u32 %s242_s22, 4  ;;  %s31_s23 = int_to_ptr.vmem [resolvable:$true] %s30_s23 }
   0x8   :  { %36 = dma.hbm_to_vmem [thread:$0]  %s29_s19, 896, %s31_s23, [#allocation6], %s240_s20, %s240_s20, %s241_s21  }
   0x9   :  { %233 = dma.done.wait [#allocation3], 256  }
   0xa   :  { %234 = vsyncadd [#allocation3], 4294967040 }
   0xb   :  { %235 = dma.done.wait [#allocation6], 896  }
   0xc   :  { %236 = vsyncadd [#allocation6], 4294966400  ;;  %vm67_vm0 = vcmask 1041408   ;;  %v55_v0 = vld [vmem:[#allocation5 + $0x30] sm:$0x3]  ;;  %v54_v1 = vld [vmem:[#allocation5 + $0x28] sm:$0xff] }
   0xd   :  { %136 = vmatpush.msk.msra.mxu0 %vm67_vm0, %v55_v0  ;;  %139 = vmatpush.msk.msra.mxu1 %vm67_vm0, %v55_v0  ;;  %v53_v2 = vld [vmem:[#allocation5 + $0x20] sm:$0xff]  ;;  %v52_v3 = vld [vmem:[#allocation5 + $0x18] sm:$0xff]  ;;  %v51_v4 = vld [vmem:[#allocation5 + $0x10] sm:$0xff]  ;;  %vm60_vm1 = vcmask 408576   ;;  %s243_s24 = smov 78   ;;  %s122_s28 = sshll.u32 %s293_s3, 4  ;;  %s123_s28 = int_to_ptr.hbm [resolvable:$true] %s122_s28 }
   0xe   :  { %v50_v5 = vld [vmem:[#allocation5 + $0x8] sm:$0xff]  ;;  %v49_v6 = vld [vmem:[#allocation5] sm:$0xff]  ;;  %v47_v7 = vld [vmem:[#allocation2] sm:$0xff] }
   0xf   :  { %81 = vmatpush.msra.mxu0 %v54_v1  ;;  %140 = vmatpush.msra.mxu1 %v54_v1  ;;  %v48_v8 = vld [vmem:[#allocation2 + $0x8] sm:$0xff]  ;;  %v152_v9 = vld [vmem:[%s292_s2] ss:$0 sm:$0xff]  ;;  %s244_s2 = smov [#allocation7]  }
  0x10   :  { %s120_s25 = sshll.u32 %s244_s2, 4  ;;  %s121_s25 = int_to_ptr.vmem [resolvable:$true] %s120_s25 }
  0x11   :  { %82 = vmatpush.msra.mxu0 %v53_v2  ;;  %141 = vmatpush.msra.mxu1 %v53_v2 }
  0x13   :  { %83 = vmatpush.msra.mxu0 %v52_v3  ;;  %142 = vmatpush.msra.mxu1 %v52_v3 }
  0x15   :  { %84 = vmatpush.msra.mxu0 %v51_v4  ;;  %143 = vmatpush.msra.mxu1 %v51_v4 }
  0x17   :  { %85 = vmatpush.msra.mxu0 %v50_v5  ;;  %144 = vmatpush.msra.mxu1 %v50_v5 }
  0x19   :  { %86 = vmatpush.msra.mxu0 %v49_v6  ;;  %145 = vmatpush.msra.mxu1 %v49_v6 }
  0x1a   :  { %137 = vmatmul.msk.f32.vlgmr.msra.gmra.mxu0 %vm60_vm1, %v47_v7  ;;  %138 = vmatmul.msk.f32.vlgmr.msra.gmra.mxu1 %vm60_vm1, %v48_v8 }
  0x97   :  { %v88_v10 = vpop.f32.mrf.mxu0  ;;  %v91_v12 = vpop.f32.mrf.mxu1 }
  0x98   :  { %v89_v11 = vadd.f32 %v152_v9, %v88_v10  ;;  %v92_v13 = vadd.f32 %v152_v9, %v91_v12 }
  0x9a   :  { %153 = vtanh.f32 %v89_v11  ;;  %v94_v16 = vmul.f32 0.5, %v89_v11  ;;  %v95_v17 = vmul.f32 0.5, %v92_v13 }
  0x9b   :  { %155 = vtanh.f32 %v92_v13 }
  0x9c   :  { %157 = vtanh.f32 %v94_v16 }
  0x9d   :  { %159 = vtanh.f32 %v95_v17 }
  0xa0   :  { %v154_v14 = vpop.eup %153 }
  0xa1   :  { %106 = vrot.lane.b32.xlu0 %v154_v14, %s243_s24  ;;  %v156_v15 = vpop.eup %155 }
  0xa2   :  { %v158_v18 = vpop.eup %157 }
  0xa3   :  { %v98_v19 = vadd.f32 1.0, %v158_v18  ;;  %v160_v21 = vpop.eup %159 }
  0xa4   :  { %v99_v24 = vadd.f32 1.0, %v160_v21 }
  0xa5   :  { %v100_v20 = vmul.f32 0.5, %v98_v19 }
  0xa6   :  { %v101_v25 = vmul.f32 0.5, %v99_v24 }
  0xa9   :  { %108 = vrot.lane.b32.xlu0 %v156_v15, %s243_s24 }
 0x113   :  { %v107_v22 = vpop.permute.xlu0 %106 }
 0x114   :  { %v112_v23 = vmul.f32 %v107_v22, %v100_v20 }
 0x116   :  { %114 = vst.msk [vmem:[#allocation7] sm:$0xff] %vm60_vm1, %v112_v23 }
 0x11b   :  { %v109_v26 = vpop.permute.xlu0 %108 }
 0x11c   :  { %v113_v27 = vmul.f32 %v109_v26, %v101_v25 }
 0x11e   :  { %115 = vst.msk [vmem:[#allocation7 + $0x8] sm:$0xff] %vm60_vm1, %v113_v27 }
 0x11f   :  { %128 = dma.vmem_to_hbm [thread:$0]  %s121_s25, 256, %s123_s28, [#allocation4], %s240_s20, %s240_s20, %s241_s21  }
 0x120   :  { %237 = dma.done.wait [#allocation4], 256  }
 0x121   :  { %238 = vsyncadd [#allocation4], 4294967040 }
 0x122   :  { %133 = vsyncpa [#allocation3], 1 }
 0x123   :  { %134 = vsyncpa [#allocation6], 1 }
 0x124   :  { %135 = vsyncpa [#allocation4], 1 }

</bundles_post_ra>
